<compile_context>
chip_gen: v6e
topology: v6e:2x2x1
jax: 0.10.0
libtpu: 0.0.40
codegen_flags: <defaults>
</compile_context>

<pallas_src>
import functools

import jax
import jax.numpy as jnp
from jax.experimental import pallas as pl
from jax.experimental.pallas import tpu as pltpu


def _shared_dropout_kernel(x_ref, u_ref, o_ref, *, rate):
    # x_ref: (1, TL1, N)  -- one L1 tile of one batch element (N = L2*C).
    # u_ref: (1, 1,  N)   -- uniform [0,1) field shared by every L1 row.
    scale = 1.0 / (1.0 - rate)
    keep = u_ref[...] >= jnp.float32(rate)                 # P(keep) = 1 - rate
    mask = jnp.where(keep, scale, 0.0).astype(x_ref.dtype)  # 0 or 1/(1-rate)
    o_ref[...] = x_ref[...] * mask                          # broadcast over TL1


def _choose_row_tile(l1, row_bytes, target_block_bytes=4 << 20):
    """Largest row count (multiple of 8, or full L1) within the block budget."""
    if l1 * row_bytes <= target_block_bytes:
        return l1
    tl1 = int((target_block_bytes // max(row_bytes, 1)) // 8 * 8)
    tl1 = max(8, tl1)
    return min(tl1, l1)


def shared_dropout(x, key, *, rate, training=True):
    """Dropout with the mask shared along axis 1 of a (B, L1, L2, C) input.

    Matches the PyTorch `Dropout(r, batch_dim=[1])` forward; identity in eval.
    """
    if (not training) or rate == 0.0:
        return x
    if rate >= 1.0:                       # PyTorch returns all zeros (avoid inf)
        return jnp.zeros_like(x)

    B, L1, L2, C = x.shape
    N = L2 * C

    # Shared (over L1) uniform field, one lane-dense row per batch element.
    u = jax.random.uniform(key, (B, 1, N), dtype=jnp.float32)

    # Lane-dense view: last dim N is always the full array dim in the BlockSpec
    # (and a large multiple of 128 at realistic RibonanzaNet shapes).
    xf = x.reshape(B, L1, N)

    itemsize = jnp.dtype(x.dtype).itemsize
    tl1 = _choose_row_tile(L1, N * itemsize)
    n_row_tiles = pl.cdiv(L1, tl1)

    block_bytes = tl1 * N * itemsize
    mask_bytes = N * 4
    # 2x double-buffered input + 2x output + mask, plus headroom; keep under
    # 48 MiB so the pipeline double-buffers on v7x (64 MiB physical VMEM) too.
    vmem_limit = min(max(4 * block_bytes + 4 * mask_bytes + (2 << 20), 32 << 20),
                     48 << 20)

    kernel = functools.partial(_shared_dropout_kernel, rate=float(rate))
    out = pl.pallas_call(
        kernel,
        out_shape=jax.ShapeDtypeStruct((B, L1, N), x.dtype),
        grid_spec=pltpu.PrefetchScalarGridSpec(
            num_scalar_prefetch=0,
            grid=(B, n_row_tiles),
            in_specs=[
                pl.BlockSpec((1, tl1, N), lambda b, i: (b, i, 0)),
                pl.BlockSpec((1, 1, N), lambda b, i: (b, 0, 0)),
            ],
            out_specs=pl.BlockSpec((1, tl1, N), lambda b, i: (b, i, 0)),
        ),
        compiler_params=pltpu.CompilerParams(
            dimension_semantics=("parallel", "parallel"),
            vmem_limit_bytes=int(vmem_limit),
        ),
    )(xf, u)
    return out.reshape(B, L1, L2, C)


if __name__ == "__main__":
    # Small shapes consistent with a pairwise representation: (B, L, L, C).
    B, L1, L2, C = 2, 8, 8, 32            # L2*C = 256 -> lane-dense last dim
    rate = 0.25
    key = jax.random.PRNGKey(0)
    xkey, mkey = jax.random.split(key)
    x = jax.random.normal(xkey, (B, L1, L2, C), dtype=jnp.float32)

    out = shared_dropout(x, mkey, rate=rate, training=True)
    out = jax.block_until_ready(out)

    # Sanity checks:
    assert out.shape == x.shape and out.dtype == x.dtype
    ratio = out / x                       # should equal the mask: 0 or 1/(1-r)
    # (a) mask values are either 0 or 1/(1-rate)
    close_zero = jnp.isclose(ratio, 0.0, atol=1e-5)
    close_scale = jnp.isclose(ratio, 1.0 / (1.0 - rate), atol=1e-4)
    assert bool(jnp.all(close_zero | close_scale))
    # (b) mask is shared along batch_dim=1 (identical across rows L1)
    assert bool(jnp.allclose(ratio, ratio[:, :1], atol=1e-4))
    # (c) eval mode is the identity
    assert bool(jnp.array_equal(
        shared_dropout(x, mkey, rate=rate, training=False), x))
    # (d) keep fraction is statistically near 1-rate
    keep_frac = float(jnp.mean((jnp.abs(ratio) > 1e-3).astype(jnp.float32)))
    assert abs(keep_frac - (1.0 - rate)) < 0.15

    print("KERNEL_OK")
</pallas_src>

<mosaic_0001>
module attributes {stable_mosaic.version = 11 : i64} {
  func.func @_shared_dropout_kernel(%arg0: i32, %arg1: i32, %arg2: memref<1x8x256xf32, #tpu.memory_space<vmem>>, %arg3: memref<1x1x256xf32, #tpu.memory_space<vmem>>, %arg4: memref<1x8x256xf32, #tpu.memory_space<vmem>>) attributes {dimension_semantics = [#tpu.dimension_semantics<parallel>, #tpu.dimension_semantics<parallel>], iteration_bounds = array<i64: 2, 1>, scalar_prefetch = 0 : i64, scratch_operands = 0 : i64, tpu.core_type = #tpu.core_type<tc>, window_params = [{transform_indices = @transform_0, window_bounds = array<i64: 1, 8, 256>}, {transform_indices = @transform_1, window_bounds = array<i64: 1, 1, 256>}, {transform_indices = @transform_2, window_bounds = array<i64: 1, 8, 256>}]} {
    %c0 = arith.constant 0 : index
    %c0_0 = arith.constant 0 : index
    %c0_1 = arith.constant 0 : index
    %0 = vector.load %arg3[%c0, %c0_0, %c0_1] : memref<1x1x256xf32, #tpu.memory_space<vmem>>, vector<1x1x256xf32>
    %cst = arith.constant 2.500000e-01 : f32
    %1 = vector.broadcast %cst : f32 to vector<1x1x256xf32>
    %2 = arith.cmpf oge, %0, %1 : vector<1x1x256xf32>
    %cst_2 = arith.constant 1.33333337 : f32
    %cst_3 = arith.constant 0.000000e+00 : f32
    %3 = vector.broadcast %cst_2 : f32 to vector<1x1x256xf32>
    %4 = vector.broadcast %cst_3 : f32 to vector<1x1x256xf32>
    %5 = arith.select %2, %3, %4 : vector<1x1x256xi1>, vector<1x1x256xf32>
    %c0_4 = arith.constant 0 : index
    %c0_5 = arith.constant 0 : index
    %c0_6 = arith.constant 0 : index
    %6 = vector.load %arg2[%c0_4, %c0_5, %c0_6] : memref<1x8x256xf32, #tpu.memory_space<vmem>>, vector<1x8x256xf32>
    %7 = vector.broadcast %5 : vector<1x1x256xf32> to vector<1x8x256xf32>
    %8 = arith.mulf %6, %7 : vector<1x8x256xf32>
    %c0_7 = arith.constant 0 : index
    %c0_8 = arith.constant 0 : index
    %c0_9 = arith.constant 0 : index
    %9 = vector.load %arg4[%c0_7, %c0_8, %c0_9] : memref<1x8x256xf32, #tpu.memory_space<vmem>>, vector<1x8x256xf32>
    tpu.vector_store %arg4[%c0_7, %c0_8, %c0_9], %8 {strides = array<i32>} : memref<1x8x256xf32, #tpu.memory_space<vmem>>, vector<1x8x256xf32>,
    return
  }
  func.func @transform_0(%arg0: i32, %arg1: i32) -> (i32, i32, i32) {
    %c0_i32 = arith.constant 0 : i32
    %c0_i32_0 = arith.constant 0 : i32
    return %arg0, %arg1, %c0_i32 : i32, i32, i32
  }
  func.func @transform_1(%arg0: i32, %arg1: i32) -> (i32, i32, i32) {
    %c0_i32 = arith.constant 0 : i32
    %c0_i32_0 = arith.constant 0 : i32
    %c0_i32_1 = arith.constant 0 : i32
    return %arg0, %c0_i32, %c0_i32_0 : i32, i32, i32
  }
  func.func @transform_2(%arg0: i32, %arg1: i32) -> (i32, i32, i32) {
    %c0_i32 = arith.constant 0 : i32
    %c0_i32_0 = arith.constant 0 : i32
    return %arg0, %arg1, %c0_i32 : i32, i32, i32
  }
}

</mosaic_0001>

<bundles_post_ra>
// kernel: tpu_custom_call.1
= control target key start
LH: loop header
LB: loop body
LE: loop exit
PB: predicated region body
PF: predicated region fallthrough
CT: control target
= control target key end

     0   :  { %7 = vsyncpa [#allocation3], 0  ;;  %s781_s0 = inlined_call_operand.hbm [shape: f32[2,8,256], index: 0, kind: input, shape index: {}]   ;;  %s782_s1 = inlined_call_operand.hbm [shape: f32[2,1,256], index: 1, kind: input, shape index: {}]   ;;  %s783_s2 = inlined_call_operand.hbm [shape: f32[2,8,256], index: 2, kind: output, shape index: {}]  }
   0x1   :  { %9 = vsyncpa [#allocation3 + $0x1], 0 }
   0x2   :  { %10 = vsyncpa [#allocation6], 0 }
   0x3   :  { %12 = vsyncpa [#allocation6 + $0x1], 0 }
   0x4   :  { %13 = vsyncpa [#allocation4], 0 }
   0x5   :  { %15 = vsyncpa [#allocation4 + $0x1], 0  ;;  %s611_s9 = smov 0   ;;  %s613_s10 = smov 0  }
   0x6   :  { %s615_s11 = smov 0   ;;  %s617_s12 = smov 0  }
   0x7   :  { %s619_s13 = smov 0   ;;  %s621_s14 = smov 0  }
   0x8 LB: > { %s360_s15 = sadd.s32 4294967295, %s590_s14   ;;  %s361_s16 = sadd.s32 4294967294, %s590_s14   ;;  %s590_s14 = sphi %s621_s14, %s21_s14   ;;  %s586_s13 = sphi %s619_s13, %s795_s13   ;;  %s582_s12 = sphi %s617_s12, %s794_s12   ;;  %s578_s11 = sphi %s615_s11, %s793_s11   ;;  %s574_s10 = sphi %s613_s10, %s792_s10   ;;  %s570_s9 = sphi %s611_s9, %s791_s9  }
   0x9   : > { %s33_s17 = sadd.s32 1, %s586_s13  ;;  %s42_s18 = sadd.s32 1, %s578_s11 }
   0xa   : > { %p35_p0 = scmp.ge.s32.totalorder %s33_s17, 2  ;;  %p49_p1 = scmp.ne.s32.totalorder %s578_s11, %s574_s10 }
   0xb   : > { %p50_p2 = scmp.eq.s32.totalorder %s590_s14, 0  ;;  %p55_p3 = scmp.ne.s32.totalorder %s574_s10, %s570_s9 }
   0xc   : > { %s797_s17 = smov (%p35_p0, %s33_s17), 0  ;;  %p56_p5 = scmp.eq.s32.totalorder %s360_s15, 0 }
   0xd   : > { %p652_p4 = por %p50_p2, %p49_p1  ;;  %s37_s20 = ssub.s32 %s586_s13, %s797_s17 }
   0xe   : > { %p107_p6 = scmp.eq.s32.totalorder %s360_s15, 1  ;;  %p40_p7 = scmp.eq.s32.totalorder %s37_s20, 0 }
   0xf   : > { %p658_p8 = por %p56_p5, %p55_p3  ;;  %p113_p10 = scmp.eq.s32.totalorder %s361_s16, 1 }
  0x10   : > { %p662_p9 = por %p107_p6, %p49_p1  ;;  %p399_p13 = scmp.lt.s32.totalorder %s590_s14, 2 }
  0x11   : > { %s667_s23 = scalar_select %p40_p7, %s578_s11, %s42_s18  }
  0x12   : > { %p669_p11 = por %p113_p10, %p55_p3  ;;  %s676_s25 = sand.u32 1, %s578_s11  }
  0x13   : > { %s364_s26 = sshll.u32 %s676_s25, 4  ;;  %s379_s27 = sshll.u32 %s586_s13, 8 }
  0x14   : > { %s145_s30 = scalar_lea.hbm %s781_s0, %s379_s27  ;;  %s137_s3 = scalar_lea.vmem [#allocation2], %s364_s26 }
  0x15   : > { %s147_s4 = sshll.u32 %s137_s3, 4  ;;  %p685_p0 = pnand %p399_p13, %p652_p4  ;;  %s148_s4 = int_to_ptr.vmem [resolvable:$true] %s147_s4 }
  0x16   : > { %p370_p1 = scmp.ge.s32.totalorder %s590_s14, 1  ;;  %p171_p2 = scmp.lt.s32.totalorder %s590_s14, 3 }
  0x17   : > { %s134_s6 = scalar_lea.sflag [#allocation3], %s676_s25  ;;  %p452_p3 = pneg %p685_p0 }
  0x18   : > { %s463_s7 = scalar_lea.vmem %s148_s4, 256  ;;  %s592_s8 = smov [#allocation2]  }
  0x19   : > { %p464_p5 = scmp.ne.s32.totalorder %s148_s4, %s463_s7  ;;  %s468_s15 = sshll.u32 %s592_s8, 4  ;;  %s469_s15 = int_to_ptr.vmem [resolvable:$false] %s468_s15 }
  0x1a   : > { %s470_s16 = scalar_lea.vmem %s469_s15, 512  ;;  %p471_p4 = scmp.lt.s32.totalorder %s148_s4, %s469_s15 }
  0x1b   : > { %p466_p6 = pnand %p464_p5, %p452_p3  ;;  %p472_p10 = scmp.lt.s32.totalorder %s470_s16, %s463_s7 }
  0x1d   : > { %p467_p7 = pneg %p466_p6  ;;  %p473_p13 = por %p472_p10, %p471_p4 }
  0x1f   : > { %p474_p12 = pnand %p473_p13, %p467_p7 }
  0x21   : > { %477 = shalt.err (!%p474_p12)
}
  0x22   : > { %391 = dma.hbm_to_vmem [thread:$0]  (!%p685_p0), %s145_s30, 256, %s148_s4, %s134_s6  }
  0x23   : > { %p703_p5 = pnand %p370_p1, %p171_p2  ;;  %s367_s19 = sshll.u32 %s676_s25, 1 }
  0x24   : > { %s380_s20 = sshll.u32 %s586_s13, 5  ;;  %s158_s29 = scalar_lea.vmem [#allocation5], %s367_s19 }
  0x25   : > { %s164_s28 = scalar_lea.hbm %s782_s1, %s380_s20  ;;  %s166_s3 = sshll.u32 %s158_s29, 4  ;;  %s167_s3 = int_to_ptr.vmem [resolvable:$true] %s166_s3 }
  0x26   : > { %s155_s7 = scalar_lea.sflag [#allocation6], %s676_s25  ;;  %s491_s8 = scalar_lea.vmem %s167_s3, 32 }
  0x27   : > { %p492_p12 = scmp.ne.s32.totalorder %s167_s3, %s491_s8  ;;  %s593_s30 = smov [#allocation5]  }
  0x28   : > { %s496_s4 = sshll.u32 %s593_s30, 4  ;;  %s497_s4 = int_to_ptr.vmem [resolvable:$false] %s496_s4 }
  0x29   : > { %p494_p6 = pnand %p492_p12, %p452_p3  ;;  %s498_s6 = scalar_lea.vmem %s497_s4, 64 }
  0x2a   : > { %p499_p1 = scmp.lt.s32.totalorder %s167_s3, %s497_s4  ;;  %p500_p2 = scmp.lt.s32.totalorder %s498_s6, %s491_s8 }
  0x2b   : > { %p495_p7 = pneg %p494_p6 }
  0x2c   : > { %p501_p4 = por %p500_p2, %p499_p1 }
  0x2e   : > { %p502_p10 = pnand %p501_p4, %p495_p7 }
  0x30   : > { %505 = shalt.err (!%p502_p10)
}
  0x31   : > { %394 = dma.hbm_to_vmem [thread:$0]  (!%p685_p0), %s164_s28, 32, %s167_s3, %s155_s7  }
  0x32   : > { %175 = sbr.rel (%p703_p5) target bundleno = 83 (0x53), region = 28  ;;  %s721_s25 = sand.u32 (!%p703_p5), 1, %s574_s10  }
  0x33   : > { %s371_s15 = sshll.u32 (!%p703_p5), %s721_s25, 4  ;;  %s178_s16 = scalar_lea.sflag (!%p703_p5), [#allocation3], %s721_s25 }
  0x34   : > { %s181_s19 = scalar_lea.vmem (!%p703_p5), [#allocation2], %s371_s15 }
  0x37   : > { %557 = dma.done.wait (%p658_p8), %s178_s16, 256  }
  0x38   : > { %559 = vsyncadd (%p658_p8), %s178_s16, 4294967040  ;;  %s372_s5 = sshll.u32 %s721_s25, 1  ;;  %s187_s18 = scalar_lea.sflag [#allocation6], %s721_s25 }
  0x39   : > { %s190_s20 = scalar_lea.vmem [#allocation5], %s372_s5 }
  0x3a   : > { %561 = dma.done.wait (%p658_p8), %s187_s18, 32  }
  0x3b   : > { %563 = vsyncadd (%p658_p8), %s187_s18, 4294967264  ;;  %v222_v0 = vlaneseq  ;;  %v216_v4 = vld [vmem:[%s190_s20] sm:$0x3]  ;;  %v594_v5 = vmov 0.0   ;;  %s215_s26 = scalar_lea.vmem [#allocation7], %s371_s15  ;;  %v220_v8 = vld [vmem:[%s181_s19 + $0x8] sm:$0xff] }
  0x3c   : > { %vm217_vm0 = vcmp.ge.f32.partialorder %v216_v4, 0.25  ;;  %v219_v7 = vld [vmem:[%s181_s19] sm:$0xff]  ;;  %s253_s27 = sshll.u32 %s215_s26, 4  ;;  %s381_s28 = sshll.u32 %s582_s12, 8  ;;  %s736_s27 = int_to_ptr.vmem [resolvable:$true] %s253_s27 }
  0x3d   : > { %v223_v1 = vshrl.u32 %v222_v0, 7  ;;  %v218_v6 = vsel %vm217_vm0, 1.3333334, %v594_v5  ;;  %s251_s3 = scalar_lea.hbm %s783_s2, %s381_s28  ;;  %s237_s7 = scalar_lea.sflag [#allocation4], %s721_s25 }
  0x3e   : > { %s506_s8 = scalar_lea.vmem %s736_s27, 256  ;;  %s595_s12 = smov [#allocation7]  }
  0x3f   : > { %v224_v2 = vsub.s32 0, %v223_v1  ;;  %v228_v3 = vsub.s32 1, %v223_v1  ;;  %p507_p8 = scmp.ne.s32.totalorder %s736_s27, %s506_s8  ;;  %s510_s30 = sshll.u32 %s595_s12, 4  ;;  %s511_s30 = int_to_ptr.vmem [resolvable:$false] %s510_s30 }
  0x40   : > { %s512_s4 = scalar_lea.vmem %s511_s30, 512  ;;  %p513_p13 = scmp.lt.s32.totalorder %s736_s27, %s511_s30 }
  0x41   : > { %v225_v9 = vrot.slane %v218_v6, %v224_v2  ;;  %v229_v10 = vrot.slane %v218_v6, %v228_v3  ;;  %p508_p0 = pnand %p507_p8, %p662_p9  ;;  %p514_p5 = scmp.lt.s32.totalorder %s512_s4, %s506_s8 }
  0x43   : > { %v232_v11 = vmul.f32 %v225_v9, %v219_v7  ;;  %v233_v12 = vmul.f32 %v229_v10, %v220_v8  ;;  %p509_p3 = pneg %p508_p0  ;;  %p515_p12 = por %p514_p5, %p513_p13 }
  0x45   : > { %234 = vst [vmem:[%s215_s26] sm:$0xff] %v232_v11  ;;  %235 = vst [vmem:[%s215_s26 + $0x8] sm:$0xff] %v233_v12  ;;  %p516_p6 = pnand %p515_p12, %p509_p3 }
  0x47   : > { %519 = shalt.err (!%p516_p6)
}
  0x48   : > { %s520_s6 = scalar_lea.hbm %s251_s3, 256  ;;  %s524_s16 = scalar_lea.hbm %s783_s2, 512 }
  0x49   : > { %p521_p7 = scmp.ne.s32.totalorder %s251_s3, %s520_s6  ;;  %p525_p4 = scmp.lt.s32.totalorder %s251_s3, %s783_s2 }
  0x4a   : > { %p526_p10 = scmp.lt.s32.totalorder %s524_s16, %s520_s6 }
  0x4b   : > { %p522_p1 = pnand %p521_p7, %p662_p9 }
  0x4c   : > { %p527_p8 = por %p526_p10, %p525_p4 }
  0x4d   : > { %p523_p2 = pneg %p522_p1 }
  0x4f   : > { %p528_p0 = pnand %p527_p8, %p523_p2 }
  0x51   : > { %531 = shalt.err (!%p528_p0)
}
  0x52   : > { %386 = dma.vmem_to_hbm [thread:$0]  (%p662_p9), %s736_s27, 256, %s251_s3, %s237_s7  }
  0x53 PF: > { %s265_s18 = sand.u32 1, %s570_s9   ;;  %p790_p3 = scmp.ge.s32.totalorder %s590_s14, 2 }
  0x54   : > { %s266_s20 = scalar_lea.sflag [#allocation4], %s265_s18 }
  0x55   : > { %p396_p13 = pnand %p790_p3, %p669_p11 }
  0x57   : > { %p397_p5 = pneg %p396_p13 }
  0x59   : > { %565 = dma.done.wait (%p397_p5), %s266_s20, 256  }
  0x5a   : > { %567 = vsyncadd (%p397_p5), %s266_s20, 4294967040  ;;  %s21_s14 = sadd.s32 1, %s590_s14   ;;  %s791_s9 = smov %s574_s10 }
  0x5b   : > { %p18_p12 = scmp.ge.s32.totalorder %s21_s14, 4   ;;  %s792_s10 = smov %s578_s11 }
  0x5c   : > { %s793_s11 = smov %s667_s23  ;;  %s794_s12 = smov %s586_s13 }
  0x5d   : > { %s795_s13 = smov %s797_s17  ;;  %20 = sbr.rel (!%p18_p12) target bundleno = 8 (0x8), region = 86 }
  0x62   :  { %271 = vsyncpa [#allocation3], 1 }
  0x63   :  { %273 = vsyncpa [#allocation3 + $0x1], 1 }
  0x64   :  { %274 = vsyncpa [#allocation6], 1 }
  0x65   :  { %276 = vsyncpa [#allocation6 + $0x1], 1 }
  0x66   :  { %277 = vsyncpa [#allocation4], 1 }
  0x67   :  { %279 = vsyncpa [#allocation4 + $0x1], 1 }

</bundles_post_ra>
